<compile_context>
chip_gen: v5e
topology: v5e:2x2
jax: 0.10.0
libtpu: 0.0.40
codegen_flags: <defaults>
</compile_context>

<pallas_src>
import functools

import jax
import jax.numpy as jnp
from jax import lax
from jax.experimental import pallas as pl
from jax.experimental.pallas import tpu as pltpu


# ----------------------------------------------------------------------------
# Pallas kernel: flash-style bilateral cross attention, lane-dense state.
#   fx_ref : (1, mid,   tq)  bf16  projected queries   (tokens on lanes)
#   fy_ref : (1, mid,   tk)  bf16  projected keys
#   fs_ref : (1, mid+1, tk)  bf16  [f_self ; ones] values (+denominator row)
#   wu_ref : (Cx, mid)  f32        folded f_up weight
#   bu_ref : (Cx, 1)    f32        folded f_up bias
#   o_ref  : (1, Cx, tq) f32
#   scratch: m_sc (1, tq), acc_sc (mid+1, tq)   -- online-softmax state
# Grid = (B, Nq_blk, Nk_blk); KV axis is LAST and 'arbitrary' (state carries
# across ki only — do not reorder the grid).
# ----------------------------------------------------------------------------
def _bca_kernel(fx_ref, fy_ref, fs_ref, wu_ref, bu_ref, o_ref, m_sc, acc_sc,
                *, mid):
    ki = pl.program_id(2)
    nk = pl.num_programs(2)

    @pl.when(ki == 0)
    def _():
        m_sc[...] = jnp.full_like(m_sc, -jnp.inf)
        acc_sc[...] = jnp.zeros_like(acc_sc)

    fx = fx_ref[0]      # (mid,   tq) bf16
    fy = fy_ref[0]      # (mid,   tk) bf16
    fs = fs_ref[0]      # (mid+1, tk) bf16  ([f_self ; ones])

    # sim[k, q] = sum_m fy[m, k] * fx[m, q]   -> (tk, tq), f32 accumulation.
    sim = lax.dot_general(fy, fx, (((0,), (0,)), ((), ())),
                          preferred_element_type=jnp.float32)

    # Online softmax over keys (sublane axis of sim); state is lane-dense.
    m_prev = m_sc[...]                                              # (1, tq)
    m_new = jnp.maximum(m_prev, jnp.max(sim, axis=0, keepdims=True))
    alpha = jnp.exp(m_prev - m_new)                                 # (1, tq)
    p = jnp.exp(sim - m_new)                                        # (tk, tq) f32

    # contrib[m, q] = sum_k fs[m, k] * p[k, q]; last row == sum_k p (denominator
    # folded into the MXU via the appended ones row).
    contrib = jnp.dot(fs, p.astype(jnp.bfloat16),
                      preferred_element_type=jnp.float32)           # (mid+1, tq)

    acc_sc[...] = alpha * acc_sc[...] + contrib
    m_sc[...] = m_new

    @pl.when(ki == nk - 1)
    def _():
        acc = acc_sc[...]                                           # (mid+1, tq)
        l = acc[mid:, :]                                            # (1, tq)
        fout = acc[:mid, :] / l                                     # exact, once per q-block
        # out[c, q] = sum_m Wu[c, m] * fout[m, q] + bu[c]           -> (Cx, tq)
        out = jnp.dot(wu_ref[...], fout,
                      preferred_element_type=jnp.float32) + bu_ref[...]
        o_ref[0] = out.astype(o_ref.dtype)                          # lane-dense store


def _pick_tiles(B, N):
    """Largest VMEM-friendly tile (<=1024); keep parallel extent >= 2 for v7x."""
    cap = 1024
    if N <= cap:
        tq = tk = N
    else:
        t = None
        for cand in (1024, 512, 256, 128):
            if N % cand == 0:
                t = cand
                break
        assert t is not None, "N must be <= 1024 or divisible by 128"
        tq = tk = t
    # v7x megacore: B * (N // tq) should be >= 2 so both TensorCores get work.
    while B * (N // tq) < 2 and tq % 2 == 0 and (tq // 2) % 128 == 0:
        tq //= 2
    return tq, tk


def _vmem_limit_bytes(tq, tk, mid, Cx):
    """Budget from actual buffer sizes (double-buffered blocks + temporaries)."""
    bf16, f32 = 2, 4
    dbuf_in = 2 * (mid * tq + mid * tk + (mid + 1) * tk) * bf16   # pipelined inputs
    dbuf_out = 2 * Cx * tq * f32                                   # pipelined output
    weights = 2 * (Cx * mid + Cx) * f32                            # wu, bu
    scratch = (tq + (mid + 1) * tq) * f32                          # m, acc
    temps = tk * tq * (2 * f32 + bf16)                             # sim + p(f32) + p(bf16)
    est = dbuf_in + dbuf_out + weights + scratch + temps
    # 2x headroom for compiler-internal scratch; clamp to v7x's 64 MiB VMEM.
    return int(min(max(2 * est, 32 << 20), 64 << 20))


def bca_attention_pallas(fx, fy, fs, wu, bu, *, tq=None, tk=None):
    """fx/fy: (B, mid, N) bf16; fs: (B, mid+1, N) bf16; wu: (Cx, mid); bu: (Cx, 1).
    Returns (B, Cx, N) float32."""
    B, mid, N = fx.shape
    Cx = wu.shape[0]

    auto_tq, auto_tk = _pick_tiles(B, N)
    tq = auto_tq if tq is None else tq
    tk = auto_tk if tk is None else tk
    assert N % tq == 0 and N % tk == 0, "N must be divisible by the tile sizes"

    grid = (B, N // tq, N // tk)
    kernel = functools.partial(_bca_kernel, mid=mid)

    return pl.pallas_call(
        kernel,
        out_shape=jax.ShapeDtypeStruct((B, Cx, N), jnp.float32),
        grid_spec=pltpu.PrefetchScalarGridSpec(
            num_scalar_prefetch=0,
            grid=grid,
            in_specs=[
                pl.BlockSpec((1, mid, tq), lambda b, qi, ki: (b, 0, qi)),       # fx
                pl.BlockSpec((1, mid, tk), lambda b, qi, ki: (b, 0, ki)),       # fy
                pl.BlockSpec((1, mid + 1, tk), lambda b, qi, ki: (b, 0, ki)),   # [fself;1]
                pl.BlockSpec(wu.shape, lambda b, qi, ki: (0, 0)),               # wu
                pl.BlockSpec(bu.shape, lambda b, qi, ki: (0, 0)),               # bu
            ],
            out_specs=pl.BlockSpec((1, Cx, tq), lambda b, qi, ki: (b, 0, qi)),
            scratch_shapes=[
                pltpu.VMEM((1, tq), jnp.float32),          # running max m
                pltpu.VMEM((mid + 1, tq), jnp.float32),    # running [numerator ; denom]
            ],
        ),
        compiler_params=pltpu.CompilerParams(
            dimension_semantics=("parallel", "parallel", "arbitrary"),
            vmem_limit_bytes=_vmem_limit_bytes(tq, tk, mid, Cx),
        ),
    )(fx, fy, fs, wu, bu)


# ----------------------------------------------------------------------------
# Glue: bilinear resize (align_corners=True), conv1x1+BN folding, projections.
# ----------------------------------------------------------------------------
def _interp_matrix(in_size, out_size):
    if out_size == 1:
        src = jnp.zeros((1,), jnp.float32)
    else:
        src = jnp.arange(out_size, dtype=jnp.float32) * (in_size - 1) / (out_size - 1)
    i0 = jnp.clip(jnp.floor(src).astype(jnp.int32), 0, in_size - 1)
    i1 = jnp.clip(i0 + 1, 0, in_size - 1)
    w = src - i0.astype(jnp.float32)
    M = jnp.zeros((out_size, in_size), jnp.float32)
    M = M.at[jnp.arange(out_size), i0].add(1.0 - w)
    M = M.at[jnp.arange(out_size), i1].add(w)
    return M


def bilinear_resize_ac(x_nchw, out_h, out_w):
    """F.interpolate(..., mode='bilinear', align_corners=True) on NCHW."""
    _, _, H, W = x_nchw.shape
    Mh = _interp_matrix(H, out_h)
    Mw = _interp_matrix(W, out_w)
    return jnp.einsum("oh,bchw,pw->bcop", Mh, x_nchw, Mw)


def _fold_conv_bn(W, gamma, beta, mean, var, eps=1e-5):
    """1x1 conv (out,in) + BatchNorm (eval) -> affine (out,in), (out,)."""
    s = gamma / jnp.sqrt(var + eps)
    return s[:, None] * W, beta - s * mean


def _fold_branch(W1, bn1, W2, bn2):
    """Conv1x1 -> BN -> Conv1x1 -> BN folded into W_eff @ x + b_eff."""
    A1, c1 = _fold_conv_bn(W1, *bn1)
    A2, c2 = _fold_conv_bn(W2, *bn2)
    return A2 @ A1, (A2 @ c1 + c2)[:, None]            # (mid, Cin), (mid, 1)


def _fold_all(params, scale):
    ws, bs = _fold_branch(params["self_w1"], params["self_bn1"],
                          params["self_w2"], params["self_bn2"])
    wx, bx = _fold_branch(params["x_w1"], params["x_bn1"],
                          params["x_w2"], params["x_bn2"])
    wy, by = _fold_branch(params["y_w1"], params["y_bn1"],
                          params["y_w2"], params["y_bn2"])
    wu_m, bu_v = _fold_conv_bn(params["up_w"], *params["up_bn"])
    wu, bu = wu_m, bu_v[:, None]
    if scale:   # fold mid**-0.5 into the query projection (scales sim identically)
        s = jnp.float32(ws.shape[0]) ** -0.5
        wx, bx = wx * s, bx * s
    return ws, bs, wx, bx, wy, by, wu, bu


def _project(w, b, x_cn):
    """(mid, C) @ (B, C, N) + (mid, 1) -> (B, mid, N), f32."""
    return jnp.einsum("mc,bcn->bmn", w, x_cn,
                      preferred_element_type=jnp.float32) + b[None]


def bca_forward(x, y, params, mid_channels, scale=False):
    """x: (B, Cx, H, W), y: (B, Cy, H, W)  ->  (B, Cx, H, W)."""
    B, Cx, H, W = x.shape
    Cy = y.shape[1]
    Hd, Wd = H // 2, W // 2
    N = Hd * Wd

    x_cn = bilinear_resize_ac(x, Hd, Wd).reshape(B, Cx, N)
    y_cn = bilinear_resize_ac(y, Hd, Wd).reshape(B, Cy, N)

    ws, bs, wx, bx, wy, by, wu, bu = _fold_all(params, scale)

    # Projections hoisted out of the attention loop (cheap O(N*C*mid) XLA
    # matmuls); stream them to the kernel in bf16. Ones row folds the softmax
    # denominator into the value matmul.
    fx = _project(wx, bx, x_cn).astype(jnp.bfloat16)               # (B, mid, N)
    fy = _project(wy, by, y_cn).astype(jnp.bfloat16)               # (B, mid, N)
    fself = _project(ws, bs, x_cn)                                 # (B, mid, N)
    fs = jnp.concatenate([fself, jnp.ones((B, 1, N), jnp.float32)],
                         axis=1).astype(jnp.bfloat16)              # (B, mid+1, N)

    out_cn = bca_attention_pallas(fx, fy, fs, wu, bu)              # (B, Cx, N)
    out_small = out_cn.reshape(B, Cx, Hd, Wd)
    return x + bilinear_resize_ac(out_small, H, W)


def bca_forward_ref(x, y, params, mid_channels, scale=False):
    """Pure-JAX reference. Mirrors the bf16 rounding points at the MXU boundary
    (same folded params, direct softmax) so the comparison checks kernel logic."""
    B, Cx, H, W = x.shape
    Cy = y.shape[1]
    Hd, Wd = H // 2, W // 2
    N = Hd * Wd
    x_cn = bilinear_resize_ac(x, Hd, Wd).reshape(B, Cx, N)
    y_cn = bilinear_resize_ac(y, Hd, Wd).reshape(B, Cy, N)
    ws, bs, wx, bx, wy, by, wu, bu = _fold_all(params, scale)
    fx = _project(wx, bx, x_cn).astype(jnp.bfloat16)               # (B, mid, N)
    fy = _project(wy, by, y_cn).astype(jnp.bfloat16)               # (B, mid, N)
    fs = _project(ws, bs, x_cn).astype(jnp.bfloat16)               # (B, mid, N)
    sim = jnp.einsum("bmq,bmk->bqk", fx, fy,
                     preferred_element_type=jnp.float32)           # (B, Nq, Nk)
    m = jnp.max(sim, axis=-1, keepdims=True)
    p = jnp.exp(sim - m)
    p_bf = p.astype(jnp.bfloat16)
    num = jnp.einsum("bqk,bmk->bmq", p_bf, fs,
                     preferred_element_type=jnp.float32)           # (B, mid, Nq)
    l = jnp.sum(p_bf.astype(jnp.float32), axis=-1)[:, None, :]     # (B, 1, Nq)
    fout = num / l
    out_cn = jnp.einsum("cm,bmq->bcq", wu, fout) + bu[None]        # (B, Cx, Nq)
    out_small = out_cn.reshape(B, Cx, Hd, Wd)
    return x + bilinear_resize_ac(out_small, H, W)


# ----------------------------------------------------------------------------
# Deterministic parameter construction (shapes per BCA.__init__).
# ----------------------------------------------------------------------------
def make_params(key, xin_channels, yin_channels, mid_channels):
    ks = iter(jax.random.split(key, 64))

    def conv(cout, cin):
        return jax.random.normal(next(ks), (cout, cin), jnp.float32) * 0.2

    def bn(c):
        gamma = 1.0 + 0.1 * jax.random.normal(next(ks), (c,), jnp.float32)
        beta = 0.1 * jax.random.normal(next(ks), (c,), jnp.float32)
        mean = 0.1 * jax.random.normal(next(ks), (c,), jnp.float32)
        var = 0.5 + jax.random.uniform(next(ks), (c,), jnp.float32)
        return (gamma, beta, mean, var)

    # NOTE: the PyTorch __init__ zero-initializes f_up's BN (identity block at
    # init); nonzero deterministic BN params are used so the attention path
    # actually contributes to the tested output.
    return {
        "self_w1": conv(mid_channels, xin_channels), "self_bn1": bn(mid_channels),
        "self_w2": conv(mid_channels, mid_channels), "self_bn2": bn(mid_channels),
        "x_w1": conv(mid_channels, xin_channels), "x_bn1": bn(mid_channels),
        "x_w2": conv(mid_channels, mid_channels), "x_bn2": bn(mid_channels),
        "y_w1": conv(mid_channels, yin_channels), "y_bn1": bn(mid_channels),
        "y_w2": conv(mid_channels, mid_channels), "y_bn2": bn(mid_channels),
        "up_w": conv(xin_channels, mid_channels), "up_bn": bn(xin_channels),
    }


if __name__ == "__main__":
    xin_channels, yin_channels, mid_channels = 4, 6, 8
    B, H, W = 2, 16, 16

    key = jax.random.PRNGKey(0)
    kx, ky, kp = jax.random.split(key, 3)
    x = jax.random.normal(kx, (B, xin_channels, H, W), jnp.float32)
    y = jax.random.normal(ky, (B, yin_channels, H, W), jnp.float32)
    params = make_params(kp, xin_channels, yin_channels, mid_channels)

    out = jax.block_until_ready(bca_forward(x, y, params, mid_channels, scale=False))
    ref = jax.block_until_ready(bca_forward_ref(x, y, params, mid_channels, scale=False))

    assert out.shape == x.shape
    assert jnp.allclose(out, ref, atol=2e-3, rtol=2e-3), "Pallas vs JAX reference mismatch"

    print("KERNEL_OK")
</pallas_src>

<mosaic_0001>
module attributes {stable_mosaic.version = 11 : i64} {
  func.func @_bca_kernel(%arg0: i32, %arg1: i32, %arg2: i32, %arg3: memref<1x8x64xbf16, #tpu.memory_space<vmem>>, %arg4: memref<1x8x64xbf16, #tpu.memory_space<vmem>>, %arg5: memref<1x9x64xbf16, #tpu.memory_space<vmem>>, %arg6: memref<4x8xf32, #tpu.memory_space<vmem>>, %arg7: memref<4x1xf32, #tpu.memory_space<vmem>>, %arg8: memref<1x4x64xf32, #tpu.memory_space<vmem>>, %arg9: memref<1x64xf32, #tpu.memory_space<vmem>>, %arg10: memref<9x64xf32, #tpu.memory_space<vmem>>) attributes {dimension_semantics = [#tpu.dimension_semantics<parallel>, #tpu.dimension_semantics<parallel>, #tpu.dimension_semantics<arbitrary>], iteration_bounds = array<i64: 2, 1, 1>, scalar_prefetch = 0 : i64, scratch_operands = 2 : i64, tpu.core_type = #tpu.core_type<tc>, window_params = [{transform_indices = @transform_0, window_bounds = array<i64: 1, 8, 64>}, {transform_indices = @transform_1, window_bounds = array<i64: 1, 8, 64>}, {transform_indices = @transform_2, window_bounds = array<i64: 1, 9, 64>}, {pipeline_mode = #tpu.pipeline_mode<synchronous>, transform_indices = @transform_3, window_bounds = array<i64: 4, 8>}, {pipeline_mode = #tpu.pipeline_mode<synchronous>, transform_indices = @transform_4, window_bounds = array<i64: 4, 1>}, {transform_indices = @transform_5, window_bounds = array<i64: 1, 4, 64>}]} {
    %c0_i32 = arith.constant 0 : i32
    %0 = arith.cmpi eq, %arg2, %c0_i32 : i32
    %1 = arith.extui %0 : i1 to i32
    %c0_i32_0 = arith.constant 0 : i32
    %2 = arith.cmpi ne, %1, %c0_i32_0 : i32
    scf.if %2 {
      %cst_21 = arith.constant 0xFF800000 : f32
      %30 = vector.broadcast %cst_21 : f32 to vector<1x64xf32>
      %c0_22 = arith.constant 0 : index
      %c0_23 = arith.constant 0 : index
      %31 = vector.load %arg9[%c0_22, %c0_23] : memref<1x64xf32, #tpu.memory_space<vmem>>, vector<1x64xf32>
      tpu.vector_store %arg9[%c0_22, %c0_23], %30 {strides = array<i32>} : memref<1x64xf32, #tpu.memory_space<vmem>>, vector<1x64xf32>,
      %cst_24 = arith.constant 0.000000e+00 : f32
      %32 = vector.broadcast %cst_24 : f32 to vector<9x64xf32>
      %c0_25 = arith.constant 0 : index
      %c0_26 = arith.constant 0 : index
      %33 = vector.load %arg10[%c0_25, %c0_26] : memref<9x64xf32, #tpu.memory_space<vmem>>, vector<9x64xf32>
      tpu.vector_store %arg10[%c0_25, %c0_26], %32 {strides = array<i32>} : memref<9x64xf32, #tpu.memory_space<vmem>>, vector<9x64xf32>,
    } else {
    }
    %c0 = arith.constant 0 : index
    %c0_1 = arith.constant 0 : index
    %c0_2 = arith.constant 0 : index
    %3 = vector.load %arg3[%c0, %c0_1, %c0_2] : memref<1x8x64xbf16, #tpu.memory_space<vmem>>, vector<1x8x64xbf16>
    %4 = vector.shape_cast %3 : vector<1x8x64xbf16> to vector<8x64xbf16>
    %c0_3 = arith.constant 0 : index
    %c0_4 = arith.constant 0 : index
    %c0_5 = arith.constant 0 : index
    %5 = vector.load %arg4[%c0_3, %c0_4, %c0_5] : memref<1x8x64xbf16, #tpu.memory_space<vmem>>, vector<1x8x64xbf16>
    %6 = vector.shape_cast %5 : vector<1x8x64xbf16> to vector<8x64xbf16>
    %c0_6 = arith.constant 0 : index
    %c0_7 = arith.constant 0 : index
    %c0_8 = arith.constant 0 : index
    %7 = vector.load %arg5[%c0_6, %c0_7, %c0_8] : memref<1x9x64xbf16, #tpu.memory_space<vmem>>, vector<1x9x64xbf16>
    %8 = vector.shape_cast %7 : vector<1x9x64xbf16> to vector<9x64xbf16>
    %cst = arith.constant dense<0.000000e+00> : vector<64x64xf32>
    %9 = tpu.matmul %6, %4, %cst {dimension_numbers = #tpu.dot_dimension_numbers<[0], [0], [1], [1], [0, 1, 1, 1], [], []>} : vector<8x64xbf16>, vector<8x64xbf16>, vector<64x64xf32> -> vector<64x64xf32>
    %c0_9 = arith.constant 0 : index
    %c0_10 = arith.constant 0 : index
    %10 = vector.load %arg9[%c0_9, %c0_10] : memref<1x64xf32, #tpu.memory_space<vmem>>, vector<1x64xf32>
    %cst_11 = arith.constant dense<0xFF800000> : vector<64xf32>
    %11 = vector.multi_reduction <maximumf>, %9, %cst_11 [0] : vector<64x64xf32> to vector<64xf32>
    %12 = vector.shape_cast %11 : vector<64xf32> to vector<1x64xf32>
    %13 = arith.maximumf %10, %12 : vector<1x64xf32>
    %14 = arith.subf %10, %13 : vector<1x64xf32>
    %15 = math.exp %14 : vector<1x64xf32>
    %16 = vector.broadcast %13 : vector<1x64xf32> to vector<64x64xf32>
    %17 = arith.subf %9, %16 : vector<64x64xf32>
    %18 = math.exp %17 : vector<64x64xf32>
    %19 = arith.truncf %18 : vector<64x64xf32> to vector<64x64xbf16>
    %cst_12 = arith.constant dense<0.000000e+00> : vector<9x64xf32>
    %20 = tpu.matmul %8, %19, %cst_12 {dimension_numbers = #tpu.dot_dimension_numbers<[1], [0], [0], [1], [0, 0, 1, 1], [], []>} : vector<9x64xbf16>, vector<64x64xbf16>, vector<9x64xf32> -> vector<9x64xf32>
    %c0_13 = arith.constant 0 : index
    %c0_14 = arith.constant 0 : index
    %21 = vector.load %arg10[%c0_13, %c0_14] : memref<9x64xf32, #tpu.memory_space<vmem>>, vector<9x64xf32>
    %22 = vector.broadcast %15 : vector<1x64xf32> to vector<9x64xf32>
    %23 = arith.mulf %22, %21 : vector<9x64xf32>
    %24 = arith.addf %23, %20 : vector<9x64xf32>
    %c0_15 = arith.constant 0 : index
    %c0_16 = arith.constant 0 : index
    %25 = vector.load %arg10[%c0_15, %c0_16] : memref<9x64xf32, #tpu.memory_space<vmem>>, vector<9x64xf32>
    tpu.vector_store %arg10[%c0_15, %c0_16], %24 {strides = array<i32>} : memref<9x64xf32, #tpu.memory_space<vmem>>, vector<9x64xf32>,
    %c0_17 = arith.constant 0 : index
    %c0_18 = arith.constant 0 : index
    %26 = vector.load %arg9[%c0_17, %c0_18] : memref<1x64xf32, #tpu.memory_space<vmem>>, vector<1x64xf32>
    tpu.vector_store %arg9[%c0_17, %c0_18], %13 {strides = array<i32>} : memref<1x64xf32, #tpu.memory_space<vmem>>, vector<1x64xf32>,
    %c0_i32_19 = arith.constant 0 : i32
    %27 = arith.cmpi eq, %arg2, %c0_i32_19 : i32
    %28 = arith.extui %27 : i1 to i32
    %c0_i32_20 = arith.constant 0 : i32
    %29 = arith.cmpi ne, %28, %c0_i32_20 : i32
    scf.if %29 {
      %c0_21 = arith.constant 0 : index
      %c0_22 = arith.constant 0 : index
      %30 = vector.load %arg10[%c0_21, %c0_22] : memref<9x64xf32, #tpu.memory_space<vmem>>, vector<9x64xf32>
      %31 = vector.extract_strided_slice %30 {offsets = [8, 0], sizes = [1, 64], strides = [1, 1]} : vector<9x64xf32> to vector<1x64xf32>
      %32 = vector.extract_strided_slice %30 {offsets = [0, 0], sizes = [8, 64], strides = [1, 1]} : vector<9x64xf32> to vector<8x64xf32>
      %33 = vector.broadcast %31 : vector<1x64xf32> to vector<8x64xf32>
      %34 = arith.divf %32, %33 : vector<8x64xf32>
      %c0_23 = arith.constant 0 : index
      %c0_24 = arith.constant 0 : index
      %35 = vector.load %arg6[%c0_23, %c0_24] : memref<4x8xf32, #tpu.memory_space<vmem>>, vector<4x8xf32>
      %cst_25 = arith.constant dense<0.000000e+00> : vector<4x64xf32>
      %36 = tpu.matmul %35, %34, %cst_25 {dimension_numbers = #tpu.dot_dimension_numbers<[1], [0], [0], [1], [0, 0, 1, 1], [], []>} : vector<4x8xf32>, vector<8x64xf32>, vector<4x64xf32> -> vector<4x64xf32>
      %c0_26 = arith.constant 0 : index
      %c0_27 = arith.constant 0 : index
      %37 = vector.load %arg7[%c0_26, %c0_27] : memref<4x1xf32, #tpu.memory_space<vmem>>, vector<4x1xf32>
      %38 = vector.broadcast %37 : vector<4x1xf32> to vector<4x64xf32>
      %39 = arith.addf %36, %38 : vector<4x64xf32>
      %c0_28 = arith.constant 0 : index
      %c0_29 = arith.constant 0 : index
      %c0_30 = arith.constant 0 : index
      %40 = vector.load %arg8[%c0_28, %c0_29, %c0_30] : memref<1x4x64xf32, #tpu.memory_space<vmem>>, vector<1x4x64xf32>
      %41 = vector.shape_cast %40 : vector<1x4x64xf32> to vector<4x64xf32>
      %42 = vector.shape_cast %39 : vector<4x64xf32> to vector<1x4x64xf32>
      tpu.vector_store %arg8[%c0_28, %c0_29, %c0_30], %42 {strides = array<i32>} : memref<1x4x64xf32, #tpu.memory_space<vmem>>, vector<1x4x64xf32>,
    } else {
    }
    return
  }
  func.func @transform_0(%arg0: i32, %arg1: i32, %arg2: i32) -> (i32, i32, i32) {
    %c0_i32 = arith.constant 0 : i32
    %c0_i32_0 = arith.constant 0 : i32
    return %arg0, %c0_i32, %arg1 : i32, i32, i32
  }
  func.func @transform_1(%arg0: i32, %arg1: i32, %arg2: i32) -> (i32, i32, i32) {
    %c0_i32 = arith.constant 0 : i32
    %c0_i32_0 = arith.constant 0 : i32
    return %arg0, %c0_i32, %arg2 : i32, i32, i32
  }
  func.func @transform_2(%arg0: i32, %arg1: i32, %arg2: i32) -> (i32, i32, i32) {
    %c0_i32 = arith.constant 0 : i32
    %c0_i32_0 = arith.constant 0 : i32
    return %arg0, %c0_i32, %arg2 : i32, i32, i32
  }
  func.func @transform_3(%arg0: i32, %arg1: i32, %arg2: i32) -> (i32, i32) {
    %c0_i32 = arith.constant 0 : i32
    %c0_i32_0 = arith.constant 0 : i32
    %c0_i32_1 = arith.constant 0 : i32
    return %c0_i32, %c0_i32_0 : i32, i32
  }
  func.func @transform_4(%arg0: i32, %arg1: i32, %arg2: i32) -> (i32, i32) {
    %c0_i32 = arith.constant 0 : i32
    %c0_i32_0 = arith.constant 0 : i32
    %c0_i32_1 = arith.constant 0 : i32
    return %c0_i32, %c0_i32_0 : i32, i32
  }
  func.func @transform_5(%arg0: i32, %arg1: i32, %arg2: i32) -> (i32, i32, i32) {
    %c0_i32 = arith.constant 0 : i32
    %c0_i32_0 = arith.constant 0 : i32
    return %arg0, %c0_i32, %arg1 : i32, i32, i32
  }
}

</mosaic_0001>

<bundles_post_ra>
// kernel: tpu_custom_call.1
= control target key start
LH: loop header
LB: loop body
LE: loop exit
PB: predicated region body
PF: predicated region fallthrough
CT: control target
= control target key end

     0   :  { %10 = vsyncpa [#allocation5], 0  ;;  %s1011_s0 = inlined_call_operand.vmem [shape: bf16[2,8,64], index: 0, kind: input, shape index: {}]   ;;  %s1012_s1 = inlined_call_operand.vmem [shape: bf16[2,8,64], index: 1, kind: input, shape index: {}]   ;;  %s1013_s2 = inlined_call_operand.vmem [shape: bf16[2,9,64], index: 2, kind: input, shape index: {}]   ;;  %s1014_s3 = inlined_call_operand.vmem [shape: f32[4,8], index: 3, kind: input, shape index: {}]   ;;  %s1015_s4 = inlined_call_operand.vmem [shape: f32[4,1], index: 4, kind: input, shape index: {}]   ;;  %s1016_s5 = inlined_call_operand.hbm [shape: f32[2,4,64], index: 5, kind: output, shape index: {}]  }
   0x1   :  { %12 = vsyncpa [#allocation5 + $0x1], 0  ;;  %s878_s18 = smov 0   ;;  %s880_s19 = smov 0  }
   0x2   :  { %s882_s20 = smov 0   ;;  %s884_s21 = smov 0  }
   0x3   :  { %s886_s22 = smov 0   ;;  %s888_s23 = smov 0  }
   0x4 LB: > { %s657_s24 = sadd.s32 4294967295, %s843_s23   ;;  %s658_s25 = sadd.s32 4294967294, %s843_s23   ;;  %s843_s23 = sphi %s888_s23, %s18_s23   ;;  %s839_s22 = sphi %s886_s22, %s1023_s22   ;;  %s835_s21 = sphi %s884_s21, %s1022_s21   ;;  %s831_s20 = sphi %s882_s20, %s1021_s20   ;;  %s827_s19 = sphi %s880_s19, %s1020_s19   ;;  %s823_s18 = sphi %s878_s18, %s1019_s18  }
   0x5   : > { %s37_s26 = sadd.s32 1, %s839_s22  ;;  %s172_s27 = sadd.s32 1, %s831_s20 }
   0x6   : > { %p39_p0 = scmp.ge.s32.totalorder %s37_s26, 2  ;;  %p182_p1 = scmp.ne.s32.totalorder %s831_s20, %s827_s19 }
   0x7   : > { %p183_p2 = scmp.eq.s32.totalorder %s657_s24, 1  ;;  %p188_p3 = scmp.ne.s32.totalorder %s827_s19, %s823_s18 }
   0x8   : > { %s1025_s26 = smov (%p39_p0, %s37_s26), 0  ;;  %p189_p5 = scmp.eq.s32.totalorder %s658_s25, 1 }
   0x9   : > { %p918_p4 = por %p183_p2, %p182_p1  ;;  %s167_s29 = ssub.s32 %s839_s22, %s1025_s26 }
   0xa   : > { %p661_p6 = scmp.ge.s32.totalorder %s843_s23, 1  ;;  %p170_p7 = scmp.eq.s32.totalorder %s167_s29, 0 }
   0xb   : > { %p925_p8 = por %p189_p5, %p188_p3  ;;  %p244_p9 = scmp.lt.s32.totalorder %s843_s23, 3 }
   0xc   : > { %s931_s6 = scalar_select %p170_p7, %s831_s20, %s172_s27  }
   0xd   : > { %p245_p10 = pnand %p661_p6, %p244_p9 }
   0xe   : > { %p289_p11 = scmp.lt.s32.totalorder (!%p245_p10), %s835_s21, 1  ;;  %s678_s10 = sshll.u32 (!%p245_p10), %s835_s21, 2 }
   0xf   : > { %248 = sbr.rel (%p245_p10) target bundleno = 739 (0x2e3), region = 40  ;;  %s545_s13 = scalar_lea.hbm (!%p245_p10), %s1016_s5, %s678_s10 }
  0x10   : > { %s549_s16 = sshll.u32 (!%p245_p10), %s545_s13, 4  ;;  %s785_s29 = scalar_lea.hbm (!%p245_p10), %s1016_s5, 8  ;;  %s550_s16 = int_to_ptr.hbm [resolvable:$true] %s549_s16 }
  0x14   : > { %s935_s7 = scalar_select %p289_p11, %s835_s21, 1  ;;  %vm354_vm0 = vcmask 1043456   ;;  %vm341_vm1 = vcmask 64512   ;;  %vm316_vm2 = vcmask 516096   ;;  %v845_v7 = vmov -inf  }
  0x15   : > { %317 = vst.msk [vmem:[#allocation2] sm:$0x1] %vm316_vm2, %v845_v7  ;;  %vm318_vm3 = vcmask 523264   ;;  %v846_v28 = vmov 0.0   ;;  %vm531_vm8 = vcmask 519168  }
  0x16   : > { %s663_s8 = sshll.u32 %s935_s7, 2  ;;  %319 = vst.msk [vmem:[#allocation3] sm:$0xff] %vm318_vm3, %v846_v28  ;;  %s681_s15 = sshll.u32 %s935_s7, 3 }
  0x17   : > { %s302_s11 = scalar_lea.vmem %s1012_s1, %s663_s8  ;;  %s295_s14 = scalar_lea.vmem %s1011_s0, %s663_s8  ;;  %320 = vst.msk [vmem:[#allocation3 + $0x8] sm:$0x1] %vm316_vm2, %v846_v28 }
  0x18   : > { %v322_v0 = vld [vmem:[%s302_s11] sm:$0xf]  ;;  %s310_s24 = scalar_lea.vmem %s1013_s2, %s681_s15  ;;  %s286_s8 = sand.u32 1, %s827_s19  }
  0x19   : > { %325 = vxpose.xlu0.c.b16.start.end [1/1] (short) (narrow) %v322_v0, 64  ;;  %v321_v1 = vld [vmem:[%s295_s14] sm:$0xf]  ;;  %s662_s9 = sshll.u32 %s286_s8, 2  ;;  %s534_s17 = scalar_lea.sflag [#allocation5], %s286_s8 }
  0x1a   : > { %v356_v2 = vsel %vm354_vm0, %v321_v1, 0  ;;  %s288_s14 = scalar_lea.vmem [#allocation4], %s662_s9 }
  0x1b   : > { %365 = vmatpush.bf16.msra.mxu0 %v356_v2  ;;  %683 = vmatpush.bf16.msra.mxu2 %v356_v2  ;;  %s547_s15 = sshll.u32 %s288_s14, 4  ;;  %s548_s15 = int_to_ptr.vmem [resolvable:$true] %s547_s15 }
  0x1c   : > { %684 = vmatpush.bf16.msra.mxu3 %v356_v2  ;;  %v387_v37 = vld [vmem:[#allocation2] sm:$0x1] }
  0xc5   : > { %v333_v3 = vpop.trf.xlu0 }
  0xc6   : > { %667 = vmatmul.msk.bf16.vlgmr.msra.gmra.mxu0 %vm341_vm1, %v333_v3 }
  0xd5   : > { %v334_v4 = vpop.trf.xlu0 }
  0xd6   : > { %668 = vmatmul.msk.bf16.vlgmr.msra.gmra.mxu2 %vm341_vm1, %v334_v4 }
  0xe5   : > { %v335_v5 = vpop.trf.xlu0 }
  0xe6   : > { %669 = vmatmul.msk.bf16.vlgmr.msra.gmra.mxu3 %vm341_vm1, %v335_v5  ;;  %v673_v5 = vld [vmem:[%s310_s24] sm:$0xf] }
  0xf5   : > { %v336_v6 = vpop.trf.xlu0 }
  0xf6   : > { %670 = vmatmul.msk.bf16.gmra.mxu3 %vm341_vm1, %v336_v6  ;;  %v682_v6 = vld [vmem:[%s310_s24] sm:$0x10]  ;;  %s779_s24 = sshra.s32 %s550_s16, 4  ;;  %s780_s24 = int_to_ptr.hbm [resolvable:$true] %s779_s24 }
  0xf7   : > { %s781_s25 = scalar_lea.hbm %s780_s24, 4  ;;  %p786_p1 = scmp.lt.s32.totalorder %s780_s24, %s1016_s5 }
  0xf8   : > { %p782_p12 = scmp.ne.s32.totalorder %s780_s24, %s781_s25  ;;  %p787_p2 = scmp.lt.s32.totalorder %s785_s29, %s781_s25 }
  0xfa   : > { %p783_p13 = pnand %p782_p12, %p918_p4  ;;  %p788_p3 = por %p787_p2, %p786_p1 }
  0xfc   : > { %p784_p0 = pneg %p783_p13 }
  0xfe   : > { %p789_p5 = pnand %p788_p3, %p784_p0 }
 0x143   : > { %v367_v10 = vpop.f32.mrf.mxu0 }
 0x144   : > { %v389_v19 = vsel %vm318_vm3, %v367_v10, -inf }
 0x14b   : > { %v369_v13 = vpop.f32.mrf.mxu0 }
 0x14c   : > { %v390_v16 = vsel %vm318_vm3, %v369_v13, -inf }
 0x159   : > { %v372_v11 = vpop.f32.mrf.mxu2 }
 0x15a   : > { %v391_v22 = vsel %vm318_vm3, %v372_v11, -inf }
 0x161   : > { %v374_v15 = vpop.f32.mrf.mxu2 }
 0x162   : > { %v392_v23 = vsel %vm318_vm3, %v374_v15, -inf }
 0x169   : > { %v377_v8 = vpop.f32.mrf.mxu3 }
 0x16a   : > { %v393_v17 = vsel %vm318_vm3, %v377_v8, -inf }
 0x16b   : > { %v394_v25 = vmax.f32 %v389_v19, %v393_v17  ;;  %v502_v19 = vld [vmem:[%s1015_s4] sm:$0xf] }
 0x171   : > { %v379_v9 = vpop.f32.mrf.mxu3 }
 0x172   : > { %v395_v14 = vsel %vm318_vm3, %v379_v9, -inf }
 0x173   : > { %v396_v20 = vmax.f32 %v390_v16, %v395_v14  ;;  %v468_v16 = vld [vmem:[#allocation3 + $0x8] sm:$0x1] }
 0x175   : > { %v401_v29 = vmax.f32 %v394_v25, %v396_v20 }
 0x179   : > { %v382_v12 = vpop.f32.mrf.mxu3 }
 0x17a   : > { %v397_v18 = vsel %vm318_vm3, %v382_v12, -inf }
 0x17b   : > { %v398_v26 = vmax.f32 %v391_v22, %v397_v18 }
 0x181   : > { %v384_v21 = vpop.f32.mrf.mxu3 }
 0x182   : > { %v399_v24 = vsel %vm318_vm3, %v384_v21, -inf }
 0x183   : > { %v400_v27 = vmax.f32 %v392_v23, %v399_v24 }
 0x185   : > { %v402_v30 = vmax.f32 %v398_v26, %v400_v27 }
 0x187   : > { %v403_v31 = vmax.f32 %v401_v29, %v402_v30 }
 0x189   : > { %v404_v32 = vrot.slane %v403_v31, 4 }
 0x18b   : > { %v405_v33 = vmax.f32 %v403_v31, %v404_v32 }
 0x18d   : > { %v406_v34 = vrot.slane %v405_v33, 2 }
 0x18f   : > { %v407_v35 = vmax.f32 %v405_v33, %v406_v34 }
 0x191   : > { %v408_v36 = vrot.slane %v407_v35, 1 }
 0x193   : > { %v409_v38 = vmax.f32 %v407_v35, %v408_v36  ;;  %v501_v35 = vld [vmem:[%s1014_s3] sm:$0xf] }
 0x195   : > { %v410_v39 = vmax.f32 %v387_v37, %v409_v38 }
 0x197   : > { %v415_v40 = vperm.slane %v410_v39, 0  ;;  %479 = vst.msk [vmem:[#allocation2] sm:$0x1] %vm316_vm2, %v410_v39  ;;  %v411_v41 = vsub.f32 %v387_v37, %v410_v39 }
 0x199   : > { %v424_v42 = vsub.f32 %v384_v21, %v415_v40  ;;  %v423_v43 = vsub.f32 %v382_v12, %v415_v40  ;;  %v421_v44 = vsub.f32 %v377_v8, %v415_v40  ;;  %v422_v45 = vsub.f32 %v379_v9, %v415_v40  ;;  %v467_v12 = vld [vmem:[#allocation3] sm:$0xff] }
 0x19a   : > { %v419_v49 = vsub.f32 %v372_v11, %v415_v40  ;;  %v420_v51 = vsub.f32 %v374_v15, %v415_v40  ;;  %v417_v53 = vsub.f32 %v367_v10, %v415_v40  ;;  %v418_v55 = vsub.f32 %v369_v13, %v415_v40 }
 0x19b   : > { %v439_v46 = vmul.f32 1.442695, %v424_v42  ;;  %v437_v47 = vmul.f32 1.442695, %v423_v43  ;;  %v433_v48 = vmul.f32 1.442695, %v421_v44  ;;  %v674_v8 = vor.u32 %v682_v6, %v673_v5 }
 0x19c   : > { %v435_v50 = vmul.f32 1.442695, %v422_v45  ;;  %v429_v52 = vmul.f32 1.442695, %v419_v49  ;;  %v431_v54 = vmul.f32 1.442695, %v420_v51 }
 0x19d   : > { %745 = vpow2.f32 %v439_v46  ;;  %v425_v57 = vmul.f32 1.442695, %v417_v53  ;;  %v427_v59 = vmul.f32 1.442695, %v418_v55  ;;  %v412_v9 = vmul.f32 1.442695, %v411_v41 }
 0x19e   : > { %747 = vpow2.f32 %v437_v47  ;;  %v847_v21 = vmov 0  }
 0x19f   : > { %749 = vpow2.f32 %v433_v48  ;;  %743 = vset.pattern.permute.xlu0 %v847_v21 }
 0x1a0   : > { %751 = vpow2.f32 %v435_v50  ;;  %505 = vperm.xlu0 %743, %v502_v19  }
 0x1a1   : > { %753 = vpow2.f32 %v429_v52 }
 0x1a2   : > { %755 = vpow2.f32 %v431_v54 }
 0x1a3   : > { %v746_v56 = vpop.eup %745  ;;  %757 = vpow2.f32 %v425_v57 }
 0x1a4   : > { %v748_v58 = vpop.eup %747  ;;  %759 = vpow2.f32 %v427_v59 }
 0x1a5   : > { %v750_v60 = vpop.eup %749  ;;  %v444_v61 = vpack.c.bf16 %v746_v56, %v748_v58  ;;  %761 = vpow2.f32 %v412_v9 }
 0x1a6   : > { %v752_v62 = vpop.eup %751 }
 0x1a7   : > { %457 = vmatpush.bf16.msra.mxu1 %v444_v61  ;;  %v754_v63 = vpop.eup %753  ;;  %v443_v0 = vpack.c.bf16 %v752_v62, %v750_v60 }
 0x1a8   : > { %v756_v1 = vpop.eup %755 }
 0x1a9   : > { %v758_v2 = vpop.eup %757  ;;  %v442_v3 = vpack.c.bf16 %v756_v1, %v754_v63 }
 0x1aa   : > { %v760_v4 = vpop.eup %759 }
 0x1ab   : > { %458 = vmatpush.bf16.msra.mxu1 %v443_v0  ;;  %v441_v7 = vpack.c.bf16 %v760_v4, %v758_v2  ;;  %v762_v10 = vpop.eup %761 }
 0x1ac   : > { %v470_v11 = vperm.slane %v762_v10, 0 }
 0x1ae   : > { %v472_v13 = vmul.f32 %v470_v11, %v467_v12  ;;  %v473_v17 = vmul.f32 %v470_v11, %v468_v16 }
 0x1af   : > { %459 = vmatpush.bf16.msra.mxu1 %v442_v3 }
 0x1b3   : > { %460 = vmatpush.bf16.msra.mxu1 %v441_v7 }
 0x1b6   : > { %675 = vmatmul.msk.bf16.vlgmr.msra.gmra.mxu1 %vm318_vm3, %v674_v8 }
 0x212   : > { %v506_v36 = vpop.permute.xlu0 %505 }
 0x233   : > { %v462_v14 = vpop.f32.mrf.mxu1 }
 0x234   : > { %v474_v15 = vadd.f32 %v472_v13, %v462_v14 }
 0x236   : > { %476 = vst.msk [vmem:[#allocation3] sm:$0xff] %vm318_vm3, %v474_v15 }
 0x23b   : > { %v464_v18 = vpop.f32.mrf.mxu1 }
 0x23c   : > { %v475_v20 = vadd.f32 %v473_v17, %v464_v18 }
 0x23d   : > { %v483_v32 = vld [vmem:[#allocation3] sm:$0xff] }
 0x23e   : > { %478 = vst.msk [vmem:[#allocation3 + $0x8] sm:$0x1] %vm316_vm2, %v475_v20 }
 0x245   : > { %v744_v22 = vld [vmem:[#allocation3 + $0x8] ss:$0 sm:$0xff] }
 0x246   : > { %763 = vrcp.f32 %v744_v22  ;;  %v497_v26 = vand.u32 2147483648, %v744_v22  ;;  %v495_v28 = vand.u32 2147483647, %v744_v22  ;;  %vm491_vm5 = vweird.f32 %v744_v22 }
 0x248   : > { %v498_v30 = vor.u32 1.1754944e-38, %v497_v26  ;;  %vm496_vm7 = vcmp.eq.f32.partialorder %v495_v28, 8.507059e+37 }
 0x24c   : > { %v764_v23 = vpop.eup %763 }
 0x24d   : > { %v487_v24 = vmul.f32 %v764_v23, %v744_v22  ;;  %vm492_vm4 = vweird.f32 %v764_v23 }
 0x24e   : > { %vm493_vm6 = vmor %vm491_vm5, %vm492_vm4 }
 0x24f   : > { %v488_v25 = vsub.f32 1.0, %v487_v24 }
 0x251   : > { %v489_v27 = vmul.f32 %v764_v23, %v488_v25 }
 0x253   : > { %v490_v29 = vadd.f32 %v764_v23, %v489_v27 }
 0x255   : > { %v494_v31 = vsel %vm493_vm6, %v764_v23, %v490_v29 }
 0x256   : > { %v499_v33 = vsel %vm496_vm7, %v498_v30, %v494_v31 }
 0x257   : > { %v500_v34 = vmul.f32 %v499_v33, %v483_v32 }
 0x259   : > { %526 = vmatpush.msrb.mxu2 %v500_v34 }
 0x25a   : > { %676 = vmatmul.msk.f32.vlgmr.msrb.gmra.mxu2 %vm341_vm1, %v501_v35 }
 0x2dd   : > { %v528_v37 = vpop.f32.mrf.mxu2 }
 0x2de   : > { %v529_v38 = vadd.f32 %v528_v37, %v506_v36 }
 0x2e0   : > { %532 = vst.msk [vmem:[%s288_s14] sm:$0xf] %vm531_vm8, %v529_v38 }
 0x2e1   : > { %792 = shalt.err (!%p789_p5)
}
 0x2e2   : > { %685 = dma.vmem_to_hbm [thread:$0]  (%p918_p4), %s548_s15, 64, %s550_s16, %s534_s17  }
 0x2e3 PF: > { %p691_p6 = scmp.ge.s32.totalorder %s843_s23, 2  ;;  %s561_s8 = sand.u32 1, %s823_s18  }
 0x2e4   : > { %s562_s10 = scalar_lea.sflag [#allocation5], %s561_s8 }
 0x2e5   : > { %p688_p7 = pnand %p691_p6, %p925_p8 }
 0x2e7   : > { %p689_p9 = pneg %p688_p7 }
 0x2e9   : > { %818 = dma.done.wait (%p689_p9), %s562_s10, 64  }
 0x2ea   : > { %820 = vsyncadd (%p689_p9), %s562_s10, 4294967232  ;;  %s18_s23 = sadd.s32 1, %s843_s23   ;;  %s1019_s18 = smov %s827_s19 }
 0x2eb   : > { %p15_p10 = scmp.ge.s32.totalorder %s18_s23, 4   ;;  %s1020_s19 = smov %s831_s20 }
 0x2ec   : > { %s1021_s20 = smov %s931_s6  ;;  %s1022_s21 = smov %s839_s22 }
 0x2ed   : > { %s1023_s22 = smov %s1025_s26  ;;  %17 = sbr.rel (!%p15_p10) target bundleno = 4 (0x4), region = 89 }
 0x2f2   :  { %568 = vsyncpa [#allocation5], 1 }
 0x2f3   :  { %570 = vsyncpa [#allocation5 + $0x1], 1 }

</bundles_post_ra>
